<compile_context>
chip_gen: v7x
topology: tpu7x:2x2x1
jax: 0.10.0
libtpu: 0.0.40
codegen_flags: <defaults>
</compile_context>

<pallas_src>
import numpy as np

import jax
import jax.numpy as jnp
from jax.experimental import pallas as pl
from jax.experimental.pallas import tpu as pltpu


# -----------------------------------------------------------------------------
# Exact (erf-based) GELU, as in torch.nn.GELU() default.
# erf uses the Abramowitz & Stegun 7.1.26 polynomial (|abs err| < 1.5e-7);
# only exp / mul / add / where / reciprocal are needed (all VPU/EUP ops).
# -----------------------------------------------------------------------------
_SQRT_HALF = 0.7071067811865475


def _erf(x):
    a1, a2, a3, a4, a5 = (0.254829592, -0.284496736, 1.421413741,
                          -1.453152027, 1.061405429)
    p = 0.3275911
    ax = jnp.abs(x)
    # approx reciprocal -> EUP slot (keeps the divide off the VALU, v5e win).
    t = pl.reciprocal(1.0 + p * ax, approx=True)
    poly = ((((a5 * t + a4) * t + a3) * t + a2) * t + a1) * t
    y = 1.0 - poly * jnp.exp(-ax * ax)
    return jnp.where(x < 0, -y, y)


def _gelu_exact(x):
    return 0.5 * x * (1.0 + _erf(x * _SQRT_HALF))


# -----------------------------------------------------------------------------
# Host-built constant matrices encoding CircPad(1) + bilinear x2
# (align_corners=False) + crop [2:-2] + even/odd interleave, as linear maps.
#
# Padded row k = real row k-1 (k=1..H); padded row 0 / H+1 are the first/last
# real rows rolled by W//2 along W.  Output row r=2m:   0.25*pad[m] + 0.75*pad[m+1]
#                              r=2m+1: 0.75*pad[m+1] + 0.25*pad[m+2]
# The "rolled" boundary rows go through Brow paired with Ccol2 = roll(Ccol).
# Padded col k = real col (k-1) mod W for ALL k (circular wrap), so the column
# map is a pure (W, 2W) matrix.
# -----------------------------------------------------------------------------
def _row_matrices(H):
    A = np.zeros((2 * H, H), np.float32)
    Bm = np.zeros((2 * H, H), np.float32)
    for m in range(H):
        r0, r1 = 2 * m, 2 * m + 1
        A[r0, m] += 0.75
        if m >= 1:
            A[r0, m - 1] += 0.25
        else:
            Bm[r0, 0] += 0.25            # top circular-pad row (rolled row 0)
        A[r1, m] += 0.75
        if m <= H - 2:
            A[r1, m + 1] += 0.25
        else:
            Bm[r1, H - 1] += 0.25        # bottom circular-pad row (rolled row H-1)
    return A, Bm


def _col_matrix(W):
    C = np.zeros((W, 2 * W), np.float32)
    for n in range(W):
        C[n, 2 * n] += 0.75
        C[(n - 1) % W, 2 * n] += 0.25
        C[n, 2 * n + 1] += 0.75
        C[(n + 1) % W, 2 * n + 1] += 0.25
    return C


# -----------------------------------------------------------------------------
# Pallas kernel: a block of Bblk batch elements per grid step.
# -----------------------------------------------------------------------------
def _upsample_kernel(x_ref, arow_ref, brow_ref, ccol_ref, ccol2_ref,
                     w_ref, bias_ref, o_ref):
    """
    x_ref     : (Bblk, Cin, H, W)      VMEM  raw input (no pre-padding)
    arow_ref  : (2H, H)                VMEM  row blend + interleave matrix
    brow_ref  : (2H, H)                VMEM  boundary (circular-pad row) matrix
    ccol_ref  : (W, 2W)                VMEM  column blend + interleave matrix
    ccol2_ref : (W, 2W)                VMEM  Ccol pre-composed with the W//2 roll
    w_ref     : (Cout*Cin,)            SMEM  1x1 conv weight (flattened)
    bias_ref  : (Cout,)                SMEM  conv bias
    o_ref     : (Bblk, Cout, 2H, 2W)   VMEM  final interleaved output
    """
    bblk, cin, H, W = x_ref.shape
    cout = o_ref.shape[1]

    # Hoist constant matrices and scalar parameters out of the loops
    # (read SMEM / VMEM once per grid step; JAX does not CSE broadcasts).
    arow = arow_ref[...]
    brow = brow_ref[...]
    ccol = ccol_ref[...]
    ccol2 = ccol2_ref[...]
    wv = [[w_ref[co * cin + ci] for ci in range(cin)] for co in range(cout)]
    bv = [bias_ref[co] for co in range(cout)]

    for b in range(bblk):
        for co in range(cout):
            # --- 1x1 conv (+ bias) before interpolation (they commute).
            #     Cin is tiny here -> VPU unroll; see TODO(synk) for big Cin.
            z = wv[co][0] * x_ref[b, 0]
            for ci in range(1, cin):
                z = z + wv[co][ci] * x_ref[b, ci]
            z = z + bv[co]                                   # (H, W)

            # --- pad + bilinear x2 + crop + interleave as MXU matmuls.
            t1 = jnp.dot(arow, z, preferred_element_type=jnp.float32)  # (2H, W)
            t2 = jnp.dot(brow, z, preferred_element_type=jnp.float32)  # (2H, W)
            y = (jnp.dot(t1, ccol, preferred_element_type=jnp.float32)
                 + jnp.dot(t2, ccol2, preferred_element_type=jnp.float32))  # (2H, 2W)

            # --- exact GELU + store the final interleaved tile directly.
            o_ref[b, co] = _gelu_exact(y)


# -----------------------------------------------------------------------------
# Batch-block sizing: amortize per-grid-step overhead, stay inside VMEM on
# v7x (64 MiB phys / 32 MiB scoped default), keep grid >= 2 when B >= 2 so
# both v7x TensorCores get work via dimension_semantics=('parallel',).
# -----------------------------------------------------------------------------
def _pick_bblk(B, Cin, Cout, H, W, vmem_budget=8 * 1024 * 1024):
    per_b = 2 * 4 * (Cin * H * W + Cout * 4 * H * W)   # double-buffered in+out, bytes
    cap = max(1, vmem_budget // per_b)
    if B >= 2:
        cap = min(cap, B // 2)
    cap = max(1, min(cap, B))
    # largest divisor of B not exceeding cap (so the grid tiles B exactly)
    return max(d for d in range(1, cap + 1) if B % d == 0)


# -----------------------------------------------------------------------------
# Wrapper: raw x in, final (B, Cout, 2H, 2W) out — no extra HBM passes.
# -----------------------------------------------------------------------------
@jax.jit
def upsample_forward(x, weight, bias):
    B, Cin, H, W = x.shape
    Cout = weight.shape[0]
    assert H % 2 == 0 and W % 2 == 0          # required by CircPad
    H2, W2 = 2 * H, 2 * W

    A, Bm = _row_matrices(H)                  # (2H, H) each
    C = _col_matrix(W)                        # (W, 2W)
    C2 = np.roll(C, W // 2, axis=0)           # Ccol composed with the W//2 roll

    bblk = _pick_bblk(B, Cin, Cout, H, W)
    grid = (B // bblk,)

    xf = x.astype(jnp.float32)
    wflat = weight.reshape(Cout * Cin).astype(jnp.float32)   # 1-D SMEM, no 2-D padding
    bias1 = bias.astype(jnp.float32)

    out = pl.pallas_call(
        _upsample_kernel,
        out_shape=jax.ShapeDtypeStruct((B, Cout, H2, W2), jnp.float32),
        grid_spec=pl.GridSpec(
            grid=grid,
            in_specs=[
                pl.BlockSpec((bblk, Cin, H, W), lambda g: (g, 0, 0, 0)),
                pl.BlockSpec((H2, H), lambda g: (0, 0)),
                pl.BlockSpec((H2, H), lambda g: (0, 0)),
                pl.BlockSpec((W, W2), lambda g: (0, 0)),
                pl.BlockSpec((W, W2), lambda g: (0, 0)),
                pl.BlockSpec(memory_space=pltpu.MemorySpace.SMEM),  # weight
                pl.BlockSpec(memory_space=pltpu.MemorySpace.SMEM),  # bias
            ],
            out_specs=pl.BlockSpec((bblk, Cout, H2, W2), lambda g: (g, 0, 0, 0)),
        ),
        compiler_params=pltpu.CompilerParams(dimension_semantics=("parallel",)),
    )(xf, jnp.asarray(A), jnp.asarray(Bm), jnp.asarray(C), jnp.asarray(C2),
      wflat, bias1)
    return out


# -----------------------------------------------------------------------------
# Independent pure-JAX reference (mirrors the PyTorch forward):
# CircPad(1) -> jax.image.resize bilinear x2 (half-pixel == align_corners=False)
# -> crop [2:-2] -> 1x1 conv + bias -> exact GELU.
# Uses jax.image.resize, NOT the closed-form phase decomposition used by the
# kernel, so a shared derivation error would be caught.
# -----------------------------------------------------------------------------
def circ_pad1(x):
    _, _, H, W = x.shape
    assert H % 2 == 0 and W % 2 == 0
    top = jnp.roll(x[:, :, :1, :], W // 2, axis=-1)   # .flip(2) is a no-op on 1 row
    bot = jnp.roll(x[:, :, -1:, :], W // 2, axis=-1)
    xp = jnp.concatenate([top, x, bot], axis=2)       # (B, C, H+2, W)
    return jnp.pad(xp, ((0, 0), (0, 0), (0, 0), (1, 1)), mode="wrap")


def ref_forward(x, weight, bias):
    B, Cin, H, W = x.shape
    Cout = weight.shape[0]
    xp = circ_pad1(x).astype(jnp.float32)                           # (B,Cin,H+2,W+2)
    up = jax.image.resize(xp, (B, Cin, 2 * (H + 2), 2 * (W + 2)),
                          method="bilinear")
    up = up[:, :, 2:-2, 2:-2]                                       # crop s=2
    y = jnp.einsum("oc,bchw->bohw", weight.reshape(Cout, Cin), up)
    y = y + bias[None, :, None, None]
    return 0.5 * y * (1.0 + jax.scipy.special.erf(y * _SQRT_HALF))


if __name__ == "__main__":
    key = jax.random.PRNGKey(0)
    kx, kw, kb = jax.random.split(key, 3)

    B, Cin, H, W = 2, 4, 16, 16
    Cout = Cin // 2          # Upsample default: out_channels = in_channels // 2

    x = jax.random.normal(kx, (B, Cin, H, W), dtype=jnp.float32)
    # Conv2d(Cin, Cout, kernel_size=1, bias=True) parameters (deterministic init)
    weight = 0.5 * jax.random.normal(kw, (Cout, Cin, 1, 1), dtype=jnp.float32)
    bias = 0.1 * jax.random.normal(kb, (Cout,), dtype=jnp.float32)

    y = jax.block_until_ready(upsample_forward(x, weight, bias))
    assert y.shape == (B, Cout, 2 * H, 2 * W), y.shape

    y_ref = ref_forward(x, weight, bias)
    err = float(jnp.max(jnp.abs(y - y_ref)))
    # tolerance covers the A&S erf polynomial (~1.5e-7) and the approx
    # EUP reciprocal inside the in-kernel GELU.
    assert err < 2e-3, f"max abs error vs independent JAX reference: {err}"

    print("KERNEL_OK")
</pallas_src>

<mosaic_0001>
module attributes {stable_mosaic.version = 11 : i64} {
  func.func @_upsample_kernel(%arg0: i32, %arg1: memref<1x4x16x16xf32, #tpu.memory_space<vmem>>, %arg2: memref<32x16xf32, #tpu.memory_space<vmem>>, %arg3: memref<32x16xf32, #tpu.memory_space<vmem>>, %arg4: memref<16x32xf32, #tpu.memory_space<vmem>>, %arg5: memref<16x32xf32, #tpu.memory_space<vmem>>, %arg6: memref<8xf32, #tpu.memory_space<smem>>, %arg7: memref<2xf32, #tpu.memory_space<smem>>, %arg8: memref<1x2x32x32xf32, #tpu.memory_space<vmem>>) attributes {dimension_semantics = [#tpu.dimension_semantics<parallel>], iteration_bounds = array<i64: 2>, scalar_prefetch = 0 : i64, scratch_operands = 0 : i64, tpu.core_type = #tpu.core_type<tc>, window_params = [{transform_indices = @transform_0, window_bounds = array<i64: 1, 4, 16, 16>}, {pipeline_mode = #tpu.pipeline_mode<synchronous>, transform_indices = @transform_1, window_bounds = array<i64: 32, 16>}, {pipeline_mode = #tpu.pipeline_mode<synchronous>, transform_indices = @transform_2, window_bounds = array<i64: 32, 16>}, {pipeline_mode = #tpu.pipeline_mode<synchronous>, transform_indices = @transform_3, window_bounds = array<i64: 16, 32>}, {pipeline_mode = #tpu.pipeline_mode<synchronous>, transform_indices = @transform_4, window_bounds = array<i64: 16, 32>}, {transform_indices = @transform_5, window_bounds = array<i64: 8>}, {transform_indices = @transform_6, window_bounds = array<i64: 2>}, {transform_indices = @transform_7, window_bounds = array<i64: 1, 2, 32, 32>}]} {
    %c0 = arith.constant 0 : index
    %c0_0 = arith.constant 0 : index
    %0 = vector.load %arg2[%c0, %c0_0] : memref<32x16xf32, #tpu.memory_space<vmem>>, vector<32x16xf32>
    %c0_1 = arith.constant 0 : index
    %c0_2 = arith.constant 0 : index
    %1 = vector.load %arg3[%c0_1, %c0_2] : memref<32x16xf32, #tpu.memory_space<vmem>>, vector<32x16xf32>
    %c0_3 = arith.constant 0 : index
    %c0_4 = arith.constant 0 : index
    %2 = vector.load %arg4[%c0_3, %c0_4] : memref<16x32xf32, #tpu.memory_space<vmem>>, vector<16x32xf32>
    %c0_5 = arith.constant 0 : index
    %c0_6 = arith.constant 0 : index
    %3 = vector.load %arg5[%c0_5, %c0_6] : memref<16x32xf32, #tpu.memory_space<vmem>>, vector<16x32xf32>
    %c0_7 = arith.constant 0 : index
    %4 = memref.load %arg6[%c0_7] : memref<8xf32, #tpu.memory_space<smem>>
    %c1 = arith.constant 1 : index
    %5 = memref.load %arg6[%c1] : memref<8xf32, #tpu.memory_space<smem>>
    %c2 = arith.constant 2 : index
    %6 = memref.load %arg6[%c2] : memref<8xf32, #tpu.memory_space<smem>>
    %c3 = arith.constant 3 : index
    %7 = memref.load %arg6[%c3] : memref<8xf32, #tpu.memory_space<smem>>
    %c4 = arith.constant 4 : index
    %8 = memref.load %arg6[%c4] : memref<8xf32, #tpu.memory_space<smem>>
    %c5 = arith.constant 5 : index
    %9 = memref.load %arg6[%c5] : memref<8xf32, #tpu.memory_space<smem>>
    %c6 = arith.constant 6 : index
    %10 = memref.load %arg6[%c6] : memref<8xf32, #tpu.memory_space<smem>>
    %c7 = arith.constant 7 : index
    %11 = memref.load %arg6[%c7] : memref<8xf32, #tpu.memory_space<smem>>
    %c0_8 = arith.constant 0 : index
    %12 = memref.load %arg7[%c0_8] : memref<2xf32, #tpu.memory_space<smem>>
    %c1_9 = arith.constant 1 : index
    %13 = memref.load %arg7[%c1_9] : memref<2xf32, #tpu.memory_space<smem>>
    %c0_10 = arith.constant 0 : index
    %c0_11 = arith.constant 0 : index
    %c0_12 = arith.constant 0 : index
    %c0_13 = arith.constant 0 : index
    %14 = vector.load %arg1[%c0_10, %c0_11, %c0_12, %c0_13] : memref<1x4x16x16xf32, #tpu.memory_space<vmem>>, vector<1x1x16x16xf32>
    %15 = vector.shape_cast %14 : vector<1x1x16x16xf32> to vector<16x16xf32>
    %16 = vector.broadcast %4 : f32 to vector<16x16xf32>
    %17 = arith.mulf %16, %15 : vector<16x16xf32>
    %c0_14 = arith.constant 0 : index
    %c1_15 = arith.constant 1 : index
    %c0_16 = arith.constant 0 : index
    %c0_17 = arith.constant 0 : index
    %18 = vector.load %arg1[%c0_14, %c1_15, %c0_16, %c0_17] : memref<1x4x16x16xf32, #tpu.memory_space<vmem>>, vector<1x1x16x16xf32>
    %19 = vector.shape_cast %18 : vector<1x1x16x16xf32> to vector<16x16xf32>
    %20 = vector.broadcast %5 : f32 to vector<16x16xf32>
    %21 = arith.mulf %20, %19 : vector<16x16xf32>
    %22 = arith.addf %17, %21 : vector<16x16xf32>
    %c0_18 = arith.constant 0 : index
    %c2_19 = arith.constant 2 : index
    %c0_20 = arith.constant 0 : index
    %c0_21 = arith.constant 0 : index
    %23 = vector.load %arg1[%c0_18, %c2_19, %c0_20, %c0_21] : memref<1x4x16x16xf32, #tpu.memory_space<vmem>>, vector<1x1x16x16xf32>
    %24 = vector.shape_cast %23 : vector<1x1x16x16xf32> to vector<16x16xf32>
    %25 = vector.broadcast %6 : f32 to vector<16x16xf32>
    %26 = arith.mulf %25, %24 : vector<16x16xf32>
    %27 = arith.addf %22, %26 : vector<16x16xf32>
    %c0_22 = arith.constant 0 : index
    %c3_23 = arith.constant 3 : index
    %c0_24 = arith.constant 0 : index
    %c0_25 = arith.constant 0 : index
    %28 = vector.load %arg1[%c0_22, %c3_23, %c0_24, %c0_25] : memref<1x4x16x16xf32, #tpu.memory_space<vmem>>, vector<1x1x16x16xf32>
    %29 = vector.shape_cast %28 : vector<1x1x16x16xf32> to vector<16x16xf32>
    %30 = vector.broadcast %7 : f32 to vector<16x16xf32>
    %31 = arith.mulf %30, %29 : vector<16x16xf32>
    %32 = arith.addf %27, %31 : vector<16x16xf32>
    %33 = vector.broadcast %12 : f32 to vector<16x16xf32>
    %34 = arith.addf %32, %33 : vector<16x16xf32>
    %cst = arith.constant dense<0.000000e+00> : vector<32x16xf32>
    %35 = tpu.matmul %0, %34, %cst {dimension_numbers = #tpu.dot_dimension_numbers<[1], [0], [0], [1], [0, 0, 1, 1], [], []>} : vector<32x16xf32>, vector<16x16xf32>, vector<32x16xf32> -> vector<32x16xf32>
    %cst_26 = arith.constant dense<0.000000e+00> : vector<32x16xf32>
    %36 = tpu.matmul %1, %34, %cst_26 {dimension_numbers = #tpu.dot_dimension_numbers<[1], [0], [0], [1], [0, 0, 1, 1], [], []>} : vector<32x16xf32>, vector<16x16xf32>, vector<32x16xf32> -> vector<32x16xf32>
    %cst_27 = arith.constant dense<0.000000e+00> : vector<32x32xf32>
    %37 = tpu.matmul %35, %2, %cst_27 {dimension_numbers = #tpu.dot_dimension_numbers<[1], [0], [0], [1], [0, 0, 1, 1], [], []>} : vector<32x16xf32>, vector<16x32xf32>, vector<32x32xf32> -> vector<32x32xf32>
    %cst_28 = arith.constant dense<0.000000e+00> : vector<32x32xf32>
    %38 = tpu.matmul %36, %3, %cst_28 {dimension_numbers = #tpu.dot_dimension_numbers<[1], [0], [0], [1], [0, 0, 1, 1], [], []>} : vector<32x16xf32>, vector<16x32xf32>, vector<32x32xf32> -> vector<32x32xf32>
    %39 = arith.addf %37, %38 : vector<32x32xf32>
    %cst_29 = arith.constant 5.000000e-01 : f32
    %40 = vector.broadcast %cst_29 : f32 to vector<32x32xf32>
    %41 = arith.mulf %40, %39 : vector<32x32xf32>
    %cst_30 = arith.constant 0.707106769 : f32
    %42 = vector.broadcast %cst_30 : f32 to vector<32x32xf32>
    %43 = arith.mulf %39, %42 : vector<32x32xf32>
    %44 = math.absf %43 : vector<32x32xf32>
    %cst_31 = arith.constant 0.327591091 : f32
    %45 = vector.broadcast %cst_31 : f32 to vector<32x32xf32>
    %46 = arith.mulf %45, %44 : vector<32x32xf32>
    %cst_32 = arith.constant 1.000000e+00 : f32
    %47 = vector.broadcast %cst_32 : f32 to vector<32x32xf32>
    %48 = arith.addf %47, %46 : vector<32x32xf32>
    %49 = tpu.reciprocal %48 {approx = true} : vector<32x32xf32> -> vector<32x32xf32>
    %cst_33 = arith.constant 1.06140542 : f32
    %50 = vector.broadcast %cst_33 : f32 to vector<32x32xf32>
    %51 = arith.mulf %50, %49 : vector<32x32xf32>
    %cst_34 = arith.constant -1.45315206 : f32
    %52 = vector.broadcast %cst_34 : f32 to vector<32x32xf32>
    %53 = arith.addf %51, %52 : vector<32x32xf32>
    %54 = arith.mulf %53, %49 : vector<32x32xf32>
    %cst_35 = arith.constant 1.42141378 : f32
    %55 = vector.broadcast %cst_35 : f32 to vector<32x32xf32>
    %56 = arith.addf %54, %55 : vector<32x32xf32>
    %57 = arith.mulf %56, %49 : vector<32x32xf32>
    %cst_36 = arith.constant -0.284496725 : f32
    %58 = vector.broadcast %cst_36 : f32 to vector<32x32xf32>
    %59 = arith.addf %57, %58 : vector<32x32xf32>
    %60 = arith.mulf %59, %49 : vector<32x32xf32>
    %cst_37 = arith.constant 0.254829586 : f32
    %61 = vector.broadcast %cst_37 : f32 to vector<32x32xf32>
    %62 = arith.addf %60, %61 : vector<32x32xf32>
    %63 = arith.mulf %62, %49 : vector<32x32xf32>
    %cst_38 = arith.constant 0.000000e+00 : f32
    %64 = vector.broadcast %cst_38 : f32 to vector<32x32xf32>
    %65 = arith.subf %64, %44 : vector<32x32xf32>
    %66 = arith.mulf %65, %44 : vector<32x32xf32>
    %67 = math.exp %66 : vector<32x32xf32>
    %68 = arith.mulf %63, %67 : vector<32x32xf32>
    %cst_39 = arith.constant 1.000000e+00 : f32
    %69 = vector.broadcast %cst_39 : f32 to vector<32x32xf32>
    %70 = arith.subf %69, %68 : vector<32x32xf32>
    %cst_40 = arith.constant 0.000000e+00 : f32
    %71 = vector.broadcast %cst_40 : f32 to vector<32x32xf32>
    %72 = arith.cmpf olt, %43, %71 : vector<32x32xf32>
    %cst_41 = arith.constant 0.000000e+00 : f32
    %73 = vector.broadcast %cst_41 : f32 to vector<32x32xf32>
    %74 = arith.subf %73, %70 : vector<32x32xf32>
    %75 = arith.select %72, %74, %70 : vector<32x32xi1>, vector<32x32xf32>
    %cst_42 = arith.constant 1.000000e+00 : f32
    %76 = vector.broadcast %cst_42 : f32 to vector<32x32xf32>
    %77 = arith.addf %76, %75 : vector<32x32xf32>
    %78 = arith.mulf %41, %77 : vector<32x32xf32>
    %c0_43 = arith.constant 0 : index
    %c0_44 = arith.constant 0 : index
    %c0_45 = arith.constant 0 : index
    %c0_46 = arith.constant 0 : index
    %79 = vector.load %arg8[%c0_43, %c0_44, %c0_45, %c0_46] : memref<1x2x32x32xf32, #tpu.memory_space<vmem>>, vector<1x1x32x32xf32>
    %80 = vector.shape_cast %79 : vector<1x1x32x32xf32> to vector<32x32xf32>
    %81 = vector.shape_cast %78 : vector<32x32xf32> to vector<1x1x32x32xf32>
    tpu.vector_store %arg8[%c0_43, %c0_44, %c0_45, %c0_46], %81 {strides = array<i32>} : memref<1x2x32x32xf32, #tpu.memory_space<vmem>>, vector<1x1x32x32xf32>,
    %c0_47 = arith.constant 0 : index
    %c0_48 = arith.constant 0 : index
    %c0_49 = arith.constant 0 : index
    %c0_50 = arith.constant 0 : index
    %82 = vector.load %arg1[%c0_47, %c0_48, %c0_49, %c0_50] : memref<1x4x16x16xf32, #tpu.memory_space<vmem>>, vector<1x1x16x16xf32>
    %83 = vector.shape_cast %82 : vector<1x1x16x16xf32> to vector<16x16xf32>
    %84 = vector.broadcast %8 : f32 to vector<16x16xf32>
    %85 = arith.mulf %84, %83 : vector<16x16xf32>
    %c0_51 = arith.constant 0 : index
    %c1_52 = arith.constant 1 : index
    %c0_53 = arith.constant 0 : index
    %c0_54 = arith.constant 0 : index
    %86 = vector.load %arg1[%c0_51, %c1_52, %c0_53, %c0_54] : memref<1x4x16x16xf32, #tpu.memory_space<vmem>>, vector<1x1x16x16xf32>
    %87 = vector.shape_cast %86 : vector<1x1x16x16xf32> to vector<16x16xf32>
    %88 = vector.broadcast %9 : f32 to vector<16x16xf32>
    %89 = arith.mulf %88, %87 : vector<16x16xf32>
    %90 = arith.addf %85, %89 : vector<16x16xf32>
    %c0_55 = arith.constant 0 : index
    %c2_56 = arith.constant 2 : index
    %c0_57 = arith.constant 0 : index
    %c0_58 = arith.constant 0 : index
    %91 = vector.load %arg1[%c0_55, %c2_56, %c0_57, %c0_58] : memref<1x4x16x16xf32, #tpu.memory_space<vmem>>, vector<1x1x16x16xf32>
    %92 = vector.shape_cast %91 : vector<1x1x16x16xf32> to vector<16x16xf32>
    %93 = vector.broadcast %10 : f32 to vector<16x16xf32>
    %94 = arith.mulf %93, %92 : vector<16x16xf32>
    %95 = arith.addf %90, %94 : vector<16x16xf32>
    %c0_59 = arith.constant 0 : index
    %c3_60 = arith.constant 3 : index
    %c0_61 = arith.constant 0 : index
    %c0_62 = arith.constant 0 : index
    %96 = vector.load %arg1[%c0_59, %c3_60, %c0_61, %c0_62] : memref<1x4x16x16xf32, #tpu.memory_space<vmem>>, vector<1x1x16x16xf32>
    %97 = vector.shape_cast %96 : vector<1x1x16x16xf32> to vector<16x16xf32>
    %98 = vector.broadcast %11 : f32 to vector<16x16xf32>
    %99 = arith.mulf %98, %97 : vector<16x16xf32>
    %100 = arith.addf %95, %99 : vector<16x16xf32>
    %101 = vector.broadcast %13 : f32 to vector<16x16xf32>
    %102 = arith.addf %100, %101 : vector<16x16xf32>
    %cst_63 = arith.constant dense<0.000000e+00> : vector<32x16xf32>
    %103 = tpu.matmul %0, %102, %cst_63 {dimension_numbers = #tpu.dot_dimension_numbers<[1], [0], [0], [1], [0, 0, 1, 1], [], []>} : vector<32x16xf32>, vector<16x16xf32>, vector<32x16xf32> -> vector<32x16xf32>
    %cst_64 = arith.constant dense<0.000000e+00> : vector<32x16xf32>
    %104 = tpu.matmul %1, %102, %cst_64 {dimension_numbers = #tpu.dot_dimension_numbers<[1], [0], [0], [1], [0, 0, 1, 1], [], []>} : vector<32x16xf32>, vector<16x16xf32>, vector<32x16xf32> -> vector<32x16xf32>
    %cst_65 = arith.constant dense<0.000000e+00> : vector<32x32xf32>
    %105 = tpu.matmul %103, %2, %cst_65 {dimension_numbers = #tpu.dot_dimension_numbers<[1], [0], [0], [1], [0, 0, 1, 1], [], []>} : vector<32x16xf32>, vector<16x32xf32>, vector<32x32xf32> -> vector<32x32xf32>
    %cst_66 = arith.constant dense<0.000000e+00> : vector<32x32xf32>
    %106 = tpu.matmul %104, %3, %cst_66 {dimension_numbers = #tpu.dot_dimension_numbers<[1], [0], [0], [1], [0, 0, 1, 1], [], []>} : vector<32x16xf32>, vector<16x32xf32>, vector<32x32xf32> -> vector<32x32xf32>
    %107 = arith.addf %105, %106 : vector<32x32xf32>
    %cst_67 = arith.constant 5.000000e-01 : f32
    %108 = vector.broadcast %cst_67 : f32 to vector<32x32xf32>
    %109 = arith.mulf %108, %107 : vector<32x32xf32>
    %cst_68 = arith.constant 0.707106769 : f32
    %110 = vector.broadcast %cst_68 : f32 to vector<32x32xf32>
    %111 = arith.mulf %107, %110 : vector<32x32xf32>
    %112 = math.absf %111 : vector<32x32xf32>
    %cst_69 = arith.constant 0.327591091 : f32
    %113 = vector.broadcast %cst_69 : f32 to vector<32x32xf32>
    %114 = arith.mulf %113, %112 : vector<32x32xf32>
    %cst_70 = arith.constant 1.000000e+00 : f32
    %115 = vector.broadcast %cst_70 : f32 to vector<32x32xf32>
    %116 = arith.addf %115, %114 : vector<32x32xf32>
    %117 = tpu.reciprocal %116 {approx = true} : vector<32x32xf32> -> vector<32x32xf32>
    %cst_71 = arith.constant 1.06140542 : f32
    %118 = vector.broadcast %cst_71 : f32 to vector<32x32xf32>
    %119 = arith.mulf %118, %117 : vector<32x32xf32>
    %cst_72 = arith.constant -1.45315206 : f32
    %120 = vector.broadcast %cst_72 : f32 to vector<32x32xf32>
    %121 = arith.addf %119, %120 : vector<32x32xf32>
    %122 = arith.mulf %121, %117 : vector<32x32xf32>
    %cst_73 = arith.constant 1.42141378 : f32
    %123 = vector.broadcast %cst_73 : f32 to vector<32x32xf32>
    %124 = arith.addf %122, %123 : vector<32x32xf32>
    %125 = arith.mulf %124, %117 : vector<32x32xf32>
    %cst_74 = arith.constant -0.284496725 : f32
    %126 = vector.broadcast %cst_74 : f32 to vector<32x32xf32>
    %127 = arith.addf %125, %126 : vector<32x32xf32>
    %128 = arith.mulf %127, %117 : vector<32x32xf32>
    %cst_75 = arith.constant 0.254829586 : f32
    %129 = vector.broadcast %cst_75 : f32 to vector<32x32xf32>
    %130 = arith.addf %128, %129 : vector<32x32xf32>
    %131 = arith.mulf %130, %117 : vector<32x32xf32>
    %cst_76 = arith.constant 0.000000e+00 : f32
    %132 = vector.broadcast %cst_76 : f32 to vector<32x32xf32>
    %133 = arith.subf %132, %112 : vector<32x32xf32>
    %134 = arith.mulf %133, %112 : vector<32x32xf32>
    %135 = math.exp %134 : vector<32x32xf32>
    %136 = arith.mulf %131, %135 : vector<32x32xf32>
    %cst_77 = arith.constant 1.000000e+00 : f32
    %137 = vector.broadcast %cst_77 : f32 to vector<32x32xf32>
    %138 = arith.subf %137, %136 : vector<32x32xf32>
    %cst_78 = arith.constant 0.000000e+00 : f32
    %139 = vector.broadcast %cst_78 : f32 to vector<32x32xf32>
    %140 = arith.cmpf olt, %111, %139 : vector<32x32xf32>
    %cst_79 = arith.constant 0.000000e+00 : f32
    %141 = vector.broadcast %cst_79 : f32 to vector<32x32xf32>
    %142 = arith.subf %141, %138 : vector<32x32xf32>
    %143 = arith.select %140, %142, %138 : vector<32x32xi1>, vector<32x32xf32>
    %cst_80 = arith.constant 1.000000e+00 : f32
    %144 = vector.broadcast %cst_80 : f32 to vector<32x32xf32>
    %145 = arith.addf %144, %143 : vector<32x32xf32>
    %146 = arith.mulf %109, %145 : vector<32x32xf32>
    %c0_81 = arith.constant 0 : index
    %c1_82 = arith.constant 1 : index
    %c0_83 = arith.constant 0 : index
    %c0_84 = arith.constant 0 : index
    %147 = vector.load %arg8[%c0_81, %c1_82, %c0_83, %c0_84] : memref<1x2x32x32xf32, #tpu.memory_space<vmem>>, vector<1x1x32x32xf32>
    %148 = vector.shape_cast %147 : vector<1x1x32x32xf32> to vector<32x32xf32>
    %149 = vector.shape_cast %146 : vector<32x32xf32> to vector<1x1x32x32xf32>
    tpu.vector_store %arg8[%c0_81, %c1_82, %c0_83, %c0_84], %149 {strides = array<i32>} : memref<1x2x32x32xf32, #tpu.memory_space<vmem>>, vector<1x1x32x32xf32>,
    return
  }
  func.func @transform_0(%arg0: i32) -> (i32, i32, i32, i32) {
    %c0_i32 = arith.constant 0 : i32
    %c0_i32_0 = arith.constant 0 : i32
    %c0_i32_1 = arith.constant 0 : i32
    %c0_i32_2 = arith.constant 0 : i32
    return %arg0, %c0_i32, %c0_i32_0, %c0_i32_1 : i32, i32, i32, i32
  }
  func.func @transform_1(%arg0: i32) -> (i32, i32) {
    %c0_i32 = arith.constant 0 : i32
    %c0_i32_0 = arith.constant 0 : i32
    %c0_i32_1 = arith.constant 0 : i32
    return %c0_i32, %c0_i32_0 : i32, i32
  }
  func.func @transform_2(%arg0: i32) -> (i32, i32) {
    %c0_i32 = arith.constant 0 : i32
    %c0_i32_0 = arith.constant 0 : i32
    %c0_i32_1 = arith.constant 0 : i32
    return %c0_i32, %c0_i32_0 : i32, i32
  }
  func.func @transform_3(%arg0: i32) -> (i32, i32) {
    %c0_i32 = arith.constant 0 : i32
    %c0_i32_0 = arith.constant 0 : i32
    %c0_i32_1 = arith.constant 0 : i32
    return %c0_i32, %c0_i32_0 : i32, i32
  }
  func.func @transform_4(%arg0: i32) -> (i32, i32) {
    %c0_i32 = arith.constant 0 : i32
    %c0_i32_0 = arith.constant 0 : i32
    %c0_i32_1 = arith.constant 0 : i32
    return %c0_i32, %c0_i32_0 : i32, i32
  }
  func.func @transform_5(%arg0: i32) -> i32 {
    %c0_i32 = arith.constant 0 : i32
    %c0_i32_0 = arith.constant 0 : i32
    return %c0_i32 : i32
  }
  func.func @transform_6(%arg0: i32) -> i32 {
    %c0_i32 = arith.constant 0 : i32
    %c0_i32_0 = arith.constant 0 : i32
    return %c0_i32 : i32
  }
  func.func @transform_7(%arg0: i32) -> (i32, i32, i32, i32) {
    %c0_i32 = arith.constant 0 : i32
    %c0_i32_0 = arith.constant 0 : i32
    %c0_i32_1 = arith.constant 0 : i32
    %c0_i32_2 = arith.constant 0 : i32
    return %arg0, %c0_i32, %c0_i32_0, %c0_i32_1 : i32, i32, i32, i32
  }
}

</mosaic_0001>

<bundles_post_ra>
// kernel: upsample_forward.1
= control target key start
LH: loop header
LB: loop body
LE: loop exit
PB: predicated region body
PF: predicated region fallthrough
CT: control target
= control target key end

     0   :  { %12 = vsyncpa [#allocation3], 0  ;;  %s2747_s0 = inlined_call_operand.hbm [shape: f32[2,4,16,16], index: 0, kind: input, shape index: {}]   ;;  %s2748_s1 = inlined_call_operand.hbm [shape: f32[32,16], index: 1, kind: input, shape index: {}]   ;;  %s2749_s2 = inlined_call_operand.hbm [shape: f32[32,16], index: 2, kind: input, shape index: {}]   ;;  %s2750_s3 = inlined_call_operand.hbm [shape: f32[16,32], index: 3, kind: input, shape index: {}]   ;;  %s2751_s4 = inlined_call_operand.vmem [shape: f32[16,32], index: 4, kind: input, shape index: {}]   ;;  %s2752_s5 = inlined_call_operand.vmem [shape: f32[8], index: 5, kind: input, shape index: {}]   ;;  %s2753_s6 = inlined_call_operand.vmem [shape: f32[2], index: 6, kind: input, shape index: {}]   ;;  %s2754_s7 = inlined_call_operand.hbm [shape: f32[2,2,32,32], index: 7, kind: output, shape index: {}]  }
   0x1   :  { %14 = vsyncpa [#allocation3 + $0x1], 0 }
   0x2   :  { %15 = vsyncpa [#allocation7], 0 }
   0x3   :  { %16 = vsyncpa [#allocation10], 0 }
   0x4   :  { %17 = vsyncpa [#allocation5], 0 }
   0x5   :  { %18 = vsyncpa [#allocation13], 0 }
   0x6   :  { %19 = vsyncpa [#allocation4], 0 }
   0x7   :  { %21 = vsyncpa [#allocation4 + $0x1], 0  ;;  %s2222_s24 = smov 0   ;;  %s2224_s25 = smov 0  }
   0x8   :  { %s2226_s26 = smov 0   ;;  %s2228_s27 = smov 0  }
   0x9 LB: > { %s2171_s28 = smov [#allocation6]   ;;  %s2243_s30 = sadd.s32 4294967295, %s2169_s27   ;;  %s2169_s27 = sphi %s2228_s27, %s2782_s27   ;;  %s2165_s26 = sphi %s2226_s26, %s2781_s26   ;;  %s2161_s25 = sphi %s2224_s25, %s2780_s25   ;;  %s2157_s24 = sphi %s2222_s24, %s2779_s24  }
   0xa   : > { %s222_s29 = sshll.u32 %s2171_s28, 4  ;;  %p1561_p0 = scmp.ge.s32.totalorder %s2169_s27, 1  ;;  %s2248_s29 = int_to_ptr.vmem [resolvable:$true] %s222_s29 }
   0xb   : > { %p2756_p1 = scmp.eq.s32.totalorder %s2243_s30, 0  ;;  %p210_p2 = scmp.lt.s32.totalorder %s2169_s27, 3 }
   0xc   : > { %s2172_s9 = smov [#allocation8]   ;;  %s2173_s12 = smov [#allocation9]  }
   0xd   : > { %p2250_p3 = pnand %p1561_p0, %p210_p2  ;;  %s235_s10 = sshll.u32 %s2172_s9, 4  ;;  %s2263_s10 = int_to_ptr.vmem [resolvable:$true] %s235_s10 }
   0xe   : > { %s248_s13 = sshll.u32 %s2173_s12, 4  ;;  %s265_s16 = sshll.u32 %s2752_s5, 4  ;;  %s2268_s13 = int_to_ptr.vmem [resolvable:$true] %s248_s13  ;;  %s266_s16 = int_to_ptr.vmem [resolvable:$true] %s265_s16 }
   0xf   : > { %p1834_p5 = pneg %p2250_p3  ;;  %s1943_s19 = scalar_lea.hbm %s2748_s1, 512 }
  0x10   : > { %p1944_p7 = scmp.ne.s32.totalorder %s2748_s1, %s1943_s19  ;;  %p1950_p11 = scmp.lt.u32.totalorder %s1943_s19, %s2748_s1 }
  0x11   : > { %p2259_p6 = pnand %p1834_p5, %p2756_p1 }
  0x13   : > { %p2278_p8 = pneg %p2259_p6 }
  0x15   : > { %p1946_p9 = pnand %p2278_p8, %p1944_p7 }
  0x17   : > { %p1947_p10 = pneg %p1946_p9 }
  0x19   : > { %p1952_p12 = pnand %p1950_p11, %p1947_p10 }
  0x1b   : > { %1955 = shalt.err (!%p1952_p12)
}
  0x1c   : > { %s1956_s9 = scalar_lea.vmem %s2248_s29, 512  ;;  %p1964_p5 = scmp.lt.s32.totalorder %s2248_s29, %s2248_s29 }
  0x1d   : > { %p1957_p13 = scmp.ne.s32.totalorder %s2248_s29, %s1956_s9  ;;  %p1965_p4 = scmp.lt.s32.totalorder %s1956_s9, %s1956_s9 }
  0x1f   : > { %p1959_p0 = pnand %p1957_p13, %p2278_p8  ;;  %p1966_p7 = por %p1965_p4, %p1964_p5 }
  0x21   : > { %p1960_p2 = pneg %p1959_p0 }
  0x23   : > { %p1967_p9 = pnand %p1966_p7, %p1960_p2 }
  0x25   : > { %1970 = shalt.err (!%p1967_p9)
}
  0x26   : > { %s2755_s12 = smov 128   ;;  %s2175_s14 = smov 8  }
  0x27   : > { %1837 = dma.hbm_to_vmem [thread:$0]  (!%p2259_p6), %s2748_s1, 512, %s2248_s29, [#allocation7], %s2755_s12, %s2755_s12, %s2175_s14  }
  0x28   : > { %s1971_s20 = scalar_lea.hbm %s2749_s2, 512 }
  0x29   : > { %p1972_p4 = scmp.ne.s32.totalorder %s2749_s2, %s1971_s20  ;;  %p1978_p12 = scmp.lt.u32.totalorder %s1971_s20, %s2749_s2 }
  0x2b   : > { %p1974_p10 = pnand %p1972_p4, %p2278_p8 }
  0x2d   : > { %p1975_p11 = pneg %p1974_p10 }
  0x2f   : > { %p1980_p13 = pnand %p1978_p12, %p1975_p11 }
  0x31   : > { %1983 = shalt.err (!%p1980_p13)
}
  0x32   : > { %s1984_s29 = scalar_lea.vmem %s2263_s10, 512  ;;  %p1992_p7 = scmp.lt.s32.totalorder %s2263_s10, %s2263_s10 }
  0x33   : > { %p1985_p0 = scmp.ne.s32.totalorder %s2263_s10, %s1984_s29  ;;  %p1993_p9 = scmp.lt.s32.totalorder %s1984_s29, %s1984_s29 }
  0x35   : > { %p1987_p2 = pnand %p1985_p0, %p2278_p8  ;;  %p1994_p4 = por %p1993_p9, %p1992_p7 }
  0x37   : > { %p1988_p5 = pneg %p1987_p2 }
  0x39   : > { %p1995_p10 = pnand %p1994_p4, %p1988_p5 }
  0x3b   : > { %1998 = shalt.err (!%p1995_p10)
}
  0x3c   : > { %1840 = dma.hbm_to_vmem [thread:$0]  (!%p2259_p6), %s2749_s2, 512, %s2263_s10, [#allocation7], %s2755_s12, %s2755_s12, %s2175_s14  }
  0x3d   : > { %s1999_s20 = scalar_lea.hbm %s2750_s3, 256 }
  0x3e   : > { %p2000_p11 = scmp.ne.s32.totalorder %s2750_s3, %s1999_s20  ;;  %p2006_p0 = scmp.lt.u32.totalorder %s1999_s20, %s2750_s3 }
  0x40   : > { %p2002_p12 = pnand %p2000_p11, %p2278_p8 }
  0x42   : > { %p2003_p13 = pneg %p2002_p12 }
  0x44   : > { %p2008_p2 = pnand %p2006_p0, %p2003_p13 }
  0x46   : > { %2011 = shalt.err (!%p2008_p2)
}
  0x47   : > { %s2012_s10 = scalar_lea.vmem %s2268_s13, 256  ;;  %p2020_p4 = scmp.lt.s32.totalorder %s2268_s13, %s2268_s13 }
  0x48   : > { %p2013_p5 = scmp.ne.s32.totalorder %s2268_s13, %s2012_s10  ;;  %p2021_p10 = scmp.lt.s32.totalorder %s2012_s10, %s2012_s10 }
  0x4a   : > { %p2015_p7 = pnand %p2013_p5, %p2278_p8  ;;  %p2022_p11 = por %p2021_p10, %p2020_p4 }
  0x4c   : > { %p2016_p9 = pneg %p2015_p7 }
  0x4e   : > { %p2023_p12 = pnand %p2022_p11, %p2016_p9 }
  0x50   : > { %2026 = shalt.err (!%p2023_p12)
}
  0x51   : > { %1843 = dma.hbm_to_vmem [thread:$0]  (!%p2259_p6), %s2750_s3, 256, %s2268_s13, [#allocation10], %s2755_s12, %s2755_s12, %s2175_s14  }
  0x52   : > { %s2027_s19 = scalar_lea.vmem %s266_s16, 16  ;;  %p2035_p5 = scmp.lt.s32.totalorder %s266_s16, %s266_s16 }
  0x53   : > { %p2028_p13 = scmp.ne.s32.totalorder %s266_s16, %s2027_s19  ;;  %p2036_p7 = scmp.lt.s32.totalorder %s2027_s19, %s2027_s19 }
  0x55   : > { %p2030_p0 = pnand %p2028_p13, %p2278_p8  ;;  %p2037_p9 = por %p2036_p7, %p2035_p5 }
  0x57   : > { %p2031_p2 = pneg %p2030_p0 }
  0x59   : > { %p2038_p4 = pnand %p2037_p9, %p2031_p2 }
  0x5b   : > { %2041 = shalt.err (!%p2038_p4)
}
  0x5c   : > { %s2176_s20 = smov [#allocation11]   ;;  %s276_s23 = sshll.u32 %s2753_s6, 4  ;;  %s277_s23 = int_to_ptr.vmem [resolvable:$true] %s276_s23 }
  0x5d   : > { %1846 = dma.vmem_to_smem (!%p2259_p6), %s266_s16, 16, %s2176_s20, [#allocation5]  }
  0x5e   : > { %s2042_s28 = scalar_lea.vmem %s277_s23, 16  ;;  %p2050_p13 = scmp.lt.s32.totalorder %s277_s23, %s277_s23 }
  0x5f   : > { %p2043_p10 = scmp.ne.s32.totalorder %s277_s23, %s2042_s28  ;;  %p2051_p0 = scmp.lt.s32.totalorder %s2042_s28, %s2042_s28 }
  0x61   : > { %p2045_p11 = pnand %p2043_p10, %p2278_p8  ;;  %p2052_p5 = por %p2051_p0, %p2050_p13 }
  0x63   : > { %p2046_p12 = pneg %p2045_p11 }
  0x65   : > { %p2053_p2 = pnand %p2052_p5, %p2046_p12 }
  0x67   : > { %2056 = shalt.err (!%p2053_p2)
}
  0x68   : > { %s2177_s9 = smov [#allocation12]   ;;  %s1560_s16 = sadd.s32 4294967294, %s2169_s27  }
  0x69   : > { %1849 = dma.vmem_to_smem (!%p2259_p6), %s277_s23, 16, %s2177_s9, [#allocation13]  }
  0x6a   : > { %s2371_s22 = sadd.s32 1, %s2169_s27   ;;  %s34_s11 = sadd.s32 1, %s2165_s26 }
  0x6b   : > { %s31_s10 = ssub.s32 %s2169_s27, %s2371_s22  ;;  %p41_p8 = scmp.ne.s32.totalorder %s2165_s26, %s2161_s25 }
  0x6c   : > { %p32_p7 = scmp.eq.s32.totalorder %s31_s10, 0  ;;  %p42_p9 = scmp.eq.s32.totalorder %s2169_s27, 0 }
  0x6d   : > { %p47_p4 = scmp.ne.s32.totalorder %s2161_s25, %s2157_s24  ;;  %p197_p10 = scmp.eq.s32.totalorder %s2243_s30, 1 }
  0x6e   : > { %s2383_s29 = scalar_select %p32_p7, %s2165_s26, %s34_s11  }
  0x6f   : > { %p43_p11 = por %p42_p9, %p41_p8  ;;  %p2387_p12 = por %p2756_p1, %p47_p4 }
  0x70   : > { %p2391_p6 = por %p197_p10, %p41_p8  ;;  %p203_p13 = scmp.eq.s32.totalorder %s1560_s16, 1 }
  0x71   : > { %s2762_s15 = scalar_select %p2387_p12, 1, 0 }
  0x72   : > { %s2763_s17 = scalar_select %p2391_p6, 1, 0 }
  0x73   : > { %p1863_p0 = scmp.lt.s32.totalorder %s2169_s27, 2  ;;  %s287_s18 = sand.u32 1, %s2165_s26  }
  0x74   : > { %p2397_p5 = por %p203_p13, %p47_p4  ;;  %s1568_s20 = sshll.u32 %s287_s18, 6 }
  0x75   : > { %s1640_s13 = sshll.u32 %s2169_s27, 10  ;;  %s291_s9 = scalar_lea.vmem [#allocation2], %s1568_s20 }
  0x76   : > { %s2764_s19 = scalar_select %p2397_p5, 1, 0 }
  0x77   : > { %s2405_s28 = scalar_lea.hbm %s2747_s0, %s1640_s13  ;;  %s298_s11 = sshll.u32 %s291_s9, 4  ;;  %s2411_s11 = int_to_ptr.vmem [resolvable:$true] %s298_s11 }
  0x78   : > { %p2407_p2 = pnand %p1863_p0, %p43_p11  ;;  %s2413_s10 = scalar_lea.sflag [#allocation3], %s287_s18 }
  0x79   : > { %s2057_s12 = scalar_lea.hbm %s2405_s28, 1024  ;;  %s2062_s21 = scalar_lea.hbm %s2747_s0, 2048 }
  0x7a   : > { %p2058_p8 = scmp.ne.s32.totalorder %s2405_s28, %s2057_s12  ;;  %p2059_p7 = pneg %p2407_p2 }
  0x7b   : > { %p2063_p10 = scmp.lt.u32.totalorder %s2405_s28, %s2747_s0  ;;  %p2064_p11 = scmp.lt.u32.totalorder %s2062_s21, %s2057_s12 }
  0x7c   : > { %p2060_p9 = pnand %p2059_p7, %p2058_p8  ;;  %p2066_p0 = scmp.lt.u32.totalorder %s2057_s12, %s2405_s28 }
  0x7d   : > { %p2065_p13 = por %p2064_p11, %p2063_p10 }
  0x7e   : > { %p2061_p4 = pneg %p2060_p9 }
  0x7f   : > { %p2067_p1 = por %p2066_p0, %p2065_p13 }
  0x81   : > { %p2068_p5 = pnand %p2067_p1, %p2061_p4 }
  0x83   : > { %2071 = shalt.err (!%p2068_p5)
}
  0x84   : > { %s2072_s18 = scalar_lea.vmem %s2411_s11, 1024  ;;  %s2178_s20 = smov [#allocation2]  }
  0x85   : > { %p2073_p8 = scmp.ne.s32.totalorder %s2411_s11, %s2072_s18  ;;  %s2077_s13 = sshll.u32 %s2178_s20, 4  ;;  %s2078_s13 = int_to_ptr.vmem [resolvable:$false] %s2077_s13 }
  0x86   : > { %s2079_s23 = scalar_lea.vmem %s2078_s13, 2048  ;;  %p2080_p12 = scmp.lt.s32.totalorder %s2411_s11, %s2078_s13 }
  0x87   : > { %p2075_p9 = pnand %p2073_p8, %p2059_p7  ;;  %p2081_p10 = scmp.lt.s32.totalorder %s2079_s23, %s2072_s18 }
  0x89   : > { %p2076_p6 = pneg %p2075_p9  ;;  %p2082_p11 = por %p2081_p10, %p2080_p12 }
  0x8b   : > { %p2083_p13 = pnand %p2082_p11, %p2076_p6 }
  0x8d   : > { %2086 = shalt.err (!%p2083_p13)
}
  0x8e   : > { %s2766_s12 = smov 128   ;;  %310 = sbr.rel (%p2250_p3) target bundleno = 722 (0x2d2), region = 48 }
  0x8f   : > { %1853 = dma.hbm_to_vmem [thread:$0]  (!%p2407_p2), %s2405_s28, 1024, %s2411_s11, %s2413_s10, %s2766_s12, %s2766_s12, %s2175_s14  }
  0x90   : > { %s2447_s21 = sand.u32 (!%p2250_p3), 1, %s2161_s25   ;;  %p2767_p1 = scmp.ne.s32.totalorder (!%p2250_p3), %s2762_s15, 0 }
  0x91   : > { %s1572_s9 = sshll.u32 (!%p2250_p3), %s2447_s21, 6  ;;  %s313_s18 = scalar_lea.sflag (!%p2250_p3), [#allocation3], %s2447_s21 }
  0x92   : > { %s2453_s16 = scalar_lea.vmem (!%p2250_p3), [#allocation2], %s1572_s9 }
  0x95   : > { %2132 = dma.done.wait (%p2767_p1), %s313_s18, 1024  }
  0x96   : > { %2134 = vsyncadd (%p2767_p1), %s313_s18, 4294966272  ;;  %p2768_p12 = scmp.eq.s32.totalorder %s2243_s30, 0 }
  0x98   : > { %2136 = dma.done.wait (%p2768_p12), [#allocation7], 1024   ;;  %p2769_p3 = pmov %p2768_p12 }
  0x9a   : > { %2138 = vsyncadd (%p2769_p3), [#allocation7], 4294966272  ;;  %p2770_p6 = pmov %p2769_p3 }
  0x9b   : > { %p2771_p5 = pmov %p2769_p3 }
  0x9c   : > { %2140 = dma.done.wait (%p2770_p6), [#allocation10], 256  }
  0x9d   : > { %2142 = vsyncadd (%p2771_p5), [#allocation10], 4294967040  ;;  %p2772_p2 = pmov %p2769_p3 }
  0x9f   : > { %2144 = dma.done.wait (%p2772_p2), [#allocation5], 16   ;;  %p2773_p7 = pmov %p2772_p2 }
  0xa0   : > { %p2774_p4 = pmov %p2772_p2 }
  0xa1   : > { %2146 = vsyncadd (%p2773_p7), [#allocation5], 4294967280 }
  0xa2   : > { %2148 = dma.done.wait (%p2774_p4), [#allocation13], 16   ;;  %p2775_p0 = pmov %p2772_p2 }
  0xa4   : > { %2150 = vsyncadd (%p2775_p0), [#allocation13], 4294967280 }
  0xa5   : > { %341 = sfence }
  0xa6   : > { %s380_s8 = sld [smem:[#allocation11]]  ;;  %s1579_s14 = sld [smem:[#allocation11 + $0x1]]  ;;  %vm422_vm0 = vcmask 130048   ;;  %v390_v0 = vld [vmem:[%s2453_s16] sm:$0xff]  ;;  %v391_v2 = vld [vmem:[%s2453_s16 + $0x8] sm:$0xff]  ;;  %v1587_v3 = vld [vmem:[%s2453_s16 + $0x10] sm:$0xff] }
  0xa7   : > { %s1580_s15 = sld [smem:[#allocation11 + $0x2]]  ;;  %s2475_s28 = sld [smem:[#allocation11 + $0x3]]  ;;  %v2480_v1 = vld [vmem:[#allocation6] sm:$0xff]  ;;  %v1588_v4 = vld [vmem:[%s2453_s16 + $0x18] sm:$0xff]  ;;  %v1590_v8 = vld [vmem:[%s2453_s16 + $0x28] sm:$0xff]  ;;  %vm915_vm3 = vcmask 261120  }
  0xa8   : > { %s2477_s11 = sld [smem:[#allocation12]]  ;;  %s2482_s10 = sld [smem:[#allocation11 + $0x4]]  ;;  %1694 = vmatprep.mubr.msk.f32.mxu1 %vm422_vm0, %v2480_v1  ;;  %v1589_v7 = vld [vmem:[%s2453_s16 + $0x20] sm:$0xff]  ;;  %v1591_v13 = vld [vmem:[%s2453_s16 + $0x30] sm:$0xff]  ;;  %v1592_v14 = vld [vmem:[%s2453_s16 + $0x38] sm:$0xff] }
  0xa9   : > { %s1583_s20 = sld [smem:[#allocation11 + $0x5]]  ;;  %s2489_s13 = sld [smem:[#allocation11 + $0x6]]  ;;  %v369_v50 = vld [vmem:[#allocation6 + $0x8] sm:$0xff]  ;;  %v370_v53 = vld [vmem:[#allocation6 + $0x10] sm:$0xff]  ;;  %v371_v55 = vld [vmem:[#allocation6 + $0x18] sm:$0xff] }
  0xaa   : > { %s2491_s23 = sld [smem:[#allocation11 + $0x7]]  ;;  %s2499_s12 = sld [smem:[#allocation12 + $0x1]]  ;;  %v372_v56 = vld [vmem:[#allocation8] sm:$0xff]  ;;  %v373_v57 = vld [vmem:[#allocation8 + $0x8] sm:$0xff]  ;;  %v374_v58 = vld [vmem:[#allocation8 + $0x10] sm:$0xff] }
  0xab   : > { %v375_v59 = vld [vmem:[#allocation8 + $0x18] sm:$0xff]  ;;  %v378_v60 = vld [vmem:[%s2751_s4] sm:$0xff]  ;;  %v379_v61 = vld [vmem:[%s2751_s4 + $0x8] sm:$0xff]  ;;  %p2776_p9 = scmp.ne.s32.totalorder %s2763_s17, 0 }
  0xac   : > { %v392_v5 = vstv %s380_s8  ;;  %v398_v6 = vstv %s1579_s14  ;;  %v1778_v62 = vpack.c.bf16 %v379_v61, %v378_v60  ;;  %v376_v63 = vld [vmem:[#allocation9] sm:$0xff] }
  0xad   : > { %v393_v9 = vmul.f32 %v392_v5, %v390_v0  ;;  %v394_v10 = vmul.f32 %v392_v5, %v391_v2  ;;  %v399_v11 = vmul.f32 %v1587_v3, %v398_v6  ;;  %v400_v12 = vmul.f32 %v1588_v4, %v398_v6 }
  0xae   : > { %v406_v15 = vstv %s1580_s15  ;;  %v414_v16 = vstv %s2475_s28  ;;  %v419_v17 = vstv %s2477_s11  ;;  %v922_v24 = vstv %s2482_s10  ;;  %1779 = vmatprep.subr.bf16.mxu0 %v1778_v62  ;;  %s2660_s15 = scalar_lea.vmem [#allocation14], %s1572_s9  ;;  %s1641_s9 = sshll.u32 %s2243_s30, 10 }
  0xaf   : > { %v401_v18 = vadd.f32 %v399_v11, %v393_v9  ;;  %v402_v19 = vadd.f32 %v400_v12, %v394_v10  ;;  %v407_v20 = vmul.f32 %v1589_v7, %v406_v15  ;;  %v408_v21 = vmul.f32 %v1590_v8, %v406_v15  ;;  %1781 = vmatpush3.bf16.msra.mxu0 %v1778_v62  ;;  %s1436_s28 = sshll.u32 %s2660_s15, 4  ;;  %s2701_s28 = int_to_ptr.vmem [resolvable:$true] %s1436_s28 }
  0xb0   : > { %v415_v22 = vmul.f32 %v1591_v13, %v414_v16  ;;  %v416_v23 = vmul.f32 %v1592_v14, %v414_v16  ;;  %v927_v25 = vstv %s1583_s20  ;;  %v923_v28 = vmul.f32 %v922_v24, %v390_v0  ;;  %v377_v0 = vld [vmem:[#allocation9 + $0x8] sm:$0xff]  ;;  %s2699_s20 = scalar_lea.hbm %s2754_s7, %s1641_s9  ;;  %s2087_s30 = scalar_lea.vmem %s2701_s28, 1024 }
  0xb1   : > { %v409_v26 = vadd.f32 %v407_v20, %v401_v18  ;;  %v410_v27 = vadd.f32 %v408_v21, %v402_v19  ;;  %v924_v29 = vmul.f32 %v922_v24, %v391_v2  ;;  %v928_v30 = vmul.f32 %v1587_v3, %v927_v25  ;;  %p2088_p8 = scmp.ne.s32.totalorder %s2701_s28, %s2087_s30 }
  0xb2   : > { %v929_v31 = vmul.f32 %v1588_v4, %v927_v25  ;;  %v934_v32 = vstv %s2489_s13  ;;  %v941_v33 = vstv %s2491_s23  ;;  %v946_v47 = vstv %s2499_s12  ;;  %s1423_s13 = scalar_lea.sflag [#allocation4], %s2447_s21  ;;  %s2179_s23 = smov [#allocation14]  }
  0xb3   : > { %v417_v34 = vadd.f32 %v415_v22, %v409_v26  ;;  %v418_v35 = vadd.f32 %v416_v23, %v410_v27  ;;  %v935_v36 = vmul.f32 %v1589_v7, %v934_v32  ;;  %v936_v37 = vmul.f32 %v1590_v8, %v934_v32  ;;  %p2089_p10 = pnand %p2088_p8, %p2776_p9  ;;  %s2091_s12 = sshll.u32 %s2179_s23, 4  ;;  %s2092_s12 = int_to_ptr.vmem [resolvable:$false] %s2091_s12 }
  0xb4   : > { %v930_v38 = vadd.f32 %v928_v30, %v923_v28  ;;  %v931_v39 = vadd.f32 %v929_v31, %v924_v29  ;;  %v942_v40 = vmul.f32 %v1591_v13, %v941_v33  ;;  %v943_v41 = vmul.f32 %v1592_v14, %v941_v33  ;;  %s2093_s18 = scalar_lea.vmem %s2092_s12, 2048  ;;  %p2094_p13 = scmp.lt.s32.totalorder %s2701_s28, %s2092_s12 }
  0xb5   : > { %v420_v42 = vadd.f32 %v419_v17, %v417_v34  ;;  %v421_v43 = vadd.f32 %v419_v17, %v418_v35  ;;  %p2090_p11 = pneg %p2089_p10  ;;  %p2095_p1 = scmp.lt.s32.totalorder %s2093_s18, %s2087_s30 }
  0xb6   : > { %v937_v44 = vadd.f32 %v935_v36, %v930_v38  ;;  %v938_v45 = vadd.f32 %v936_v37, %v931_v39 }
  0xb7   : > { %v1770_v46 = vpack.c.bf16 %v421_v43, %v420_v42  ;;  %p2096_p12 = por %p2095_p1, %p2094_p13 }
  0xb8   : > { %v944_v48 = vadd.f32 %v942_v40, %v937_v44  ;;  %v945_v49 = vadd.f32 %v943_v41, %v938_v45 }
  0xb9   : > { %1771 = vmatprep.subr.bf16.mxu1 %v1770_v46  ;;  %p2097_p3 = pnand %p2096_p12, %p2090_p11 }
  0xba   : > { %1773 = vmatpush3.bf16.msra.mxu1 %v1770_v46  ;;  %v947_v51 = vadd.f32 %v946_v47, %v944_v48  ;;  %v948_v52 = vadd.f32 %v946_v47, %v945_v49 }
  0xbb   : > { %1775 = vmatprep.subr.bf16.mxu1 %v1770_v46 }
  0xbc   : > { %v1786_v54 = vpack.c.bf16 %v948_v52, %v947_v51 }
  0xbd   : > { %1695 = vmatmul.mubr.msk.f32.vlgmr.msra.gmra.mrb[0].mxu1 %vm422_vm0, %v369_v50 }
  0xbe   : > { %1777 = vmatpush3.bf16.msra.mxu1 %v1770_v46  ;;  %1697 = vmatprep.mubr.msk.f32.mxu1 %vm422_vm0, %v370_v53 }
  0xbf   : > { %1787 = vmatprep.subr.bf16.mxu1 %v1786_v54 }
  0xc1   : > { %1698 = vmatmul.mubr.msk.f32.gmra.mrb[2].mxu1 %vm422_vm0, %v371_v55 }
  0xc2   : > { %1704 = vmatprep.mubr.msk.f32.mxu1 %vm422_vm0, %v372_v56 }
  0xc5   : > { %1705 = vmatmul.mubr.msk.f32.vlgmr.msra.gmra.mrb[4].mxu1 %vm422_vm0, %v373_v57 }
  0xc6   : > { %1789 = vmatpush3.bf16.msra.mxu1 %v1786_v54  ;;  %1707 = vmatprep.mubr.msk.f32.mxu1 %vm422_vm0, %v374_v58 }
  0xc7   : > { %1791 = vmatprep.subr.bf16.mxu1 %v1786_v54 }
  0xc9   : > { %1708 = vmatmul.mubr.msk.f32.gmra.mrb[6].mxu1 %vm422_vm0, %v375_v59 }
  0xca   : > { %1734 = vmatprep.mubr.msk.f32.mxu1 %vm422_vm0, %v2480_v1  ;;  %v1782_v1 = vpack.c.bf16 %v377_v0, %v376_v63 }
  0xcc   : > { %1783 = vmatprep.subr.bf16.mxu0 %v1782_v1 }
  0xcd   : > { %1735 = vmatmul.mubr.msk.f32.vlgmr.msra.gmra.mrb[8].mxu1 %vm422_vm0, %v369_v50 }
  0xce   : > { %1793 = vmatpush3.bf16.msra.mxu1 %v1786_v54  ;;  %1737 = vmatprep.mubr.msk.f32.mxu1 %vm422_vm0, %v370_v53 }
  0xd1   : > { %1738 = vmatmul.mubr.msk.f32.gmra.mrb[10].mxu1 %vm422_vm0, %v371_v55 }
  0xd2   : > { %1744 = vmatprep.mubr.msk.f32.mxu1 %vm422_vm0, %v372_v56 }
  0xd5   : > { %1745 = vmatmul.mubr.msk.f32.vlgmr.msra.gmra.mrb[12].mxu1 %vm422_vm0, %v373_v57 }
  0xd6   : > { %1747 = vmatprep.mubr.msk.f32.mxu1 %vm422_vm0, %v374_v58 }
  0xd9   : > { %1748 = vmatmul.mubr.msk.f32.gmra.mrb[14].mxu1 %vm422_vm0, %v375_v59 }
 0x190   : > { %v1696_v2 = vpop.f32.mrb[0].mxu1 }
 0x191   : > { %v501_v3 = vpop.f32.mrb[1].mxu1 }
 0x194   : > { %v1699_v4 = vpop.f32.mrb[2].mxu1 }
 0x195   : > { %v511_v5 = vpop.f32.mrb[3].mxu1 }
 0x198   : > { %v1706_v6 = vpop.f32.mrb[4].mxu1 }
 0x199   : > { %v598_v7 = vpop.f32.mrb[5].mxu1 }
 0x19a   : > { %1714 = vmatprep.mubr.msk.f32.mxu0 %vm422_vm0, %v598_v7 }
 0x19b   : > { %1715 = vmatmul.mubr.msk.f32.vlgmr.msra.gmra.mrb[0].mxu0 %vm422_vm0, %v1706_v6 }
 0x19c   : > { %v1709_v8 = vpop.f32.mrb[6].mxu1  ;;  %1785 = vmatpush3.bf16.msra.mxu0 %v1782_v1 }
 0x19d   : > { %v608_v9 = vpop.f32.mrb[7].mxu1  ;;  %1795 = vmatprep.subr.bf16.mxu0 %v1778_v62 }
 0x19e   : > { %1717 = vmatprep.mubr.msk.f32.mxu0 %vm422_vm0, %v608_v9 }
 0x19f   : > { %1718 = vmatmul.mubr.msk.f32.gmra.mrb[2].mxu0 %vm422_vm0, %v1709_v8 }
 0x1a0   : > { %1724 = vmatprep.mubr.msk.f32.mxu0 %vm422_vm0, %v501_v3  ;;  %v1736_v10 = vpop.f32.mrb[8].mxu1 }
 0x1a1   : > { %v1015_v11 = vpop.f32.mrb[9].mxu1 }
 0x1a3   : > { %1725 = vmatmul.mubr.msk.f32.vlgmr.msra.gmra.mrb[0].mxu0 %vm422_vm0, %v1696_v2 }
 0x1a4   : > { %1727 = vmatprep.mubr.msk.f32.mxu0 %vm422_vm0, %v511_v5  ;;  %v1739_v12 = vpop.f32.mrb[10].mxu1  ;;  %1797 = vmatpush3.bf16.msra.mxu0 %v1778_v62 }
 0x1a5   : > { %v1025_v13 = vpop.f32.mrb[11].mxu1  ;;  %1799 = vmatprep.subr.bf16.mxu0 %v1782_v1 }
 0x1a7   : > { %1728 = vmatmul.mubr.msk.f32.gmra.mrb[2].mxu0 %vm422_vm0, %v1699_v4 }
 0x1a8   : > { %v1746_v14 = vpop.f32.mrb[12].mxu1 }
 0x1a9   : > { %v1100_v15 = vpop.f32.mrb[13].mxu1 }
 0x1aa   : > { %1754 = vmatprep.mubr.msk.f32.mxu0 %vm422_vm0, %v1100_v15 }
 0x1ab   : > { %1755 = vmatmul.mubr.msk.f32.vlgmr.msra.gmra.mrb[4].mxu0 %vm422_vm0, %v1746_v14 }
 0x1ac   : > { %v1749_v16 = vpop.f32.mrb[14].mxu1  ;;  %1801 = vmatpush3.bf16.msra.mxu0 %v1782_v1 }
 0x1ad   : > { %v1110_v17 = vpop.f32.mrb[15].mxu1 }
 0x1ae   : > { %1757 = vmatprep.mubr.msk.f32.mxu0 %vm422_vm0, %v1110_v17 }
 0x1af   : > { %1758 = vmatmul.mubr.msk.f32.gmra.mrb[6].mxu0 %vm422_vm0, %v1749_v16 }
 0x1b0   : > { %1764 = vmatprep.mubr.msk.f32.mxu0 %vm422_vm0, %v1015_v11 }
 0x1b3   : > { %1765 = vmatmul.mubr.msk.f32.vlgmr.msra.gmra.mrb[4].mxu0 %vm422_vm0, %v1736_v10 }
 0x1b4   : > { %1767 = vmatprep.mubr.msk.f32.mxu0 %vm422_vm0, %v1025_v13 }
 0x1b7   : > { %1768 = vmatmul.mubr.msk.f32.gmra.mrb[6].mxu0 %vm422_vm0, %v1739_v12 }
 0x276   : > { %v2543_v18 = vpop.f32.mrb[0].mxu0 }
 0x277   : > { %v2546_v19 = vmul.f32 0.70710677, %v2543_v18  ;;  %v2548_v20 = vpop.f32.mrb[1].mxu0  ;;  %v2602_v17 = vmul.f32 0.5, %v2543_v18 }
 0x278   : > { %v2551_v21 = vmul.f32 0.70710677, %v2548_v20 }
 0x279   : > { %v820_v22 = vand.u32 2147483647, %v2546_v19  ;;  %vm896_vm1 = vcmp.lt.f32.partialorder %v2546_v19, 0.0 }
 0x27a   : > { %v819_v23 = vand.u32 2147483647, %v2551_v21  ;;  %v2555_v24 = vpop.f32.mrb[2].mxu0  ;;  %vm895_vm2 = vcmp.lt.f32.partialorder %v2551_v21, 0.0 }
 0x27b   : > { %v824_v25 = vmul.f32 0.3275911, %v820_v22  ;;  %v2558_v26 = vmul.f32 0.70710677, %v2555_v24  ;;  %v2560_v28 = vpop.f32.mrb[3].mxu0  ;;  %v872_v35 = vsub.f32 0.0, %v820_v22 }
 0x27c   : > { %v823_v27 = vmul.f32 0.3275911, %v819_v23  ;;  %v2564_v32 = vmul.f32 0.70710677, %v2560_v28  ;;  %v871_v36 = vsub.f32 0.0, %v819_v23 }
 0x27d   : > { %v828_v29 = vadd.f32 1.0, %v824_v25  ;;  %v822_v30 = vand.u32 2147483647, %v2558_v26  ;;  %v876_v41 = vmul.f32 %v872_v35, %v820_v22  ;;  %vm898_vm4 = vcmp.lt.f32.partialorder %v2558_v26, 0.0 }
 0x27e   : > { %v827_v31 = vadd.f32 1.0, %v823_v27  ;;  %v821_v34 = vand.u32 2147483647, %v2564_v32  ;;  %v875_v42 = vmul.f32 %v871_v36, %v819_v23  ;;  %vm897_vm5 = vcmp.lt.f32.partialorder %v2564_v32, 0.0 }
 0x27f   : > { %1911 = vrcp.f32 %v828_v29  ;;  %v826_v33 = vmul.f32 0.3275911, %v822_v30  ;;  %v874_v39 = vsub.f32 0.0, %v822_v30  ;;  %v881_v49 = vmul.f32 1.442695, %v876_v41 }
 0x280   : > { %1913 = vrcp.f32 %v827_v31  ;;  %v825_v38 = vmul.f32 0.3275911, %v821_v34  ;;  %v879_v50 = vmul.f32 1.442695, %v875_v42  ;;  %v873_v54 = vsub.f32 0.0, %v821_v34 }
 0x281   : > { %v830_v37 = vadd.f32 1.0, %v826_v33  ;;  %v878_v44 = vmul.f32 %v874_v39, %v822_v30  ;;  %v2613_v39 = vmul.f32 0.5, %v2548_v20 }
 0x282   : > { %v829_v40 = vadd.f32 1.0, %v825_v38  ;;  %v877_v5 = vmul.f32 %v873_v54, %v821_v34 }
 0x283   : > { %1915 = vrcp.f32 %v830_v37  ;;  %v885_v58 = vmul.f32 1.442695, %v878_v44 }
 0x284   : > { %1917 = vrcp.f32 %v829_v40  ;;  %v883_v29 = vmul.f32 1.442695, %v877_v5 }
 0x285   : > { %1919 = vpow2.f32 %v881_v49  ;;  %v2618_v49 = vmul.f32 0.5, %v2555_v24 }
 0x286   : > { %v2567_v43 = vpop.f32.mrb[4].mxu0 }
 0x287   : > { %v2570_v45 = vmul.f32 0.70710677, %v2567_v43  ;;  %v2572_v46 = vpop.f32.mrb[5].mxu0 }
 0x288   : > { %v2575_v47 = vmul.f32 0.70710677, %v2572_v46 }
 0x289   : > { %v2577_v48 = vpop.eup %1911  ;;  %v1322_v51 = vand.u32 2147483647, %v2570_v45  ;;  %vm1398_vm6 = vcmp.lt.f32.partialorder %v2570_v45, 0.0 }
 0x28a   : > { %v2580_v52 = vpop.eup %1913  ;;  %v836_v53 = vmul.f32 1.0614054, %v2577_v48  ;;  %v1321_v55 = vand.u32 2147483647, %v2575_v47  ;;  %v2584_v56 = vpop.f32.mrb[6].mxu0  ;;  %vm1397_vm7 = vcmp.lt.f32.partialorder %v2575_v47, 0.0 }
 0x28b   : > { %v835_v57 = vmul.f32 1.0614054, %v2580_v52  ;;  %v1326_v59 = vmul.f32 0.3275911, %v1322_v51  ;;  %v2587_v62 = vpop.f32.mrb[7].mxu0  ;;  %v1374_v8 = vsub.f32 0.0, %v1322_v51 }
 0x28c   : > { %v840_v60 = vadd.f32 -1.4531521, %v836_v53  ;;  %v1325_v61 = vmul.f32 0.3275911, %v1321_v55  ;;  %v2592_v2 = vmul.f32 0.70710677, %v2584_v56 }
 0x28d   : > { %v2589_v63 = vpop.eup %1915  ;;  %v839_v0 = vadd.f32 -1.4531521, %v835_v57  ;;  %v1330_v1 = vadd.f32 1.0, %v1326_v59  ;;  %v1373_v13 = vsub.f32 0.0, %v1321_v55  ;;  %v1378_v34 = vmul.f32 %v1374_v8, %v1322_v51 }
 0x28e   : > { %v844_v3 = vmul.f32 %v2577_v48, %v840_v60  ;;  %v838_v4 = vmul.f32 1.0614054, %v2589_v63  ;;  %v1329_v6 = vadd.f32 1.0, %v1325_v61  ;;  %v1324_v9 = vand.u32 2147483647, %v2592_v2  ;;  %v2598_v10 = vpop.eup %1917 }
 0x28f   : > { %v843_v7 = vmul.f32 %v2580_v52, %v839_v0  ;;  %1921 = vrcp.f32 %v1330_v1  ;;  %v837_v15 = vmul.f32 1.0614054, %v2598_v10  ;;  %v1377_v35 = vmul.f32 %v1373_v13, %v1321_v55  ;;  %v1920_v42 = vpop.eup %1919 }
 0x290   : > { %v848_v11 = vadd.f32 1.4214138, %v844_v3  ;;  %v842_v12 = vadd.f32 -1.4531521, %v838_v4  ;;  %1923 = vrcp.f32 %v1329_v6  ;;  %v1328_v16 = vmul.f32 0.3275911, %v1324_v9 }
 0x291   : > { %v847_v14 = vadd.f32 1.4214138, %v843_v7  ;;  %1925 = vpow2.f32 %v879_v50  ;;  %v841_v27 = vadd.f32 -1.4531521, %v837_v15  ;;  %v2609_v18 = vmul.f32 0.70710677, %v2587_v62 }
 0x292   : > { %v852_v22 = vmul.f32 %v2577_v48, %v848_v11  ;;  %v846_v23 = vmul.f32 %v2589_v63, %v842_v12  ;;  %1927 = vpow2.f32 %v885_v58  ;;  %v1332_v30 = vadd.f32 1.0, %v1328_v16 }
 0x293   : > { %v851_v25 = vmul.f32 %v2580_v52, %v847_v14  ;;  %v845_v37 = vmul.f32 %v2598_v10, %v841_v27  ;;  %v1376_v41 = vsub.f32 0.0, %v1324_v9  ;;  %v2621_v51 = vand.u32 2147483647, %v2609_v18 }
 0x294   : > { %v856_v31 = vadd.f32 -0.28449672, %v852_v22  ;;  %v850_v33 = vadd.f32 1.4214138, %v846_v23  ;;  %1929 = vrcp.f32 %v1332_v30  ;;  %v1383_v55 = vmul.f32 1.442695, %v1378_v34 }
 0x295   : > { %v855_v36 = vadd.f32 -0.28449672, %v851_v25  ;;  %v849_v50 = vadd.f32 1.4214138, %v845_v37  ;;  %1931 = vpow2.f32 %v883_v29  ;;  %v1381_v59 = vmul.f32 1.442695, %v1377_v35 }
 0x296   : > { %v860_v38 = vmul.f32 %v2577_v48, %v856_v31  ;;  %v854_v40 = vmul.f32 %v2589_v63, %v850_v33  ;;  %v1327_v60 = vmul.f32 0.3275911, %v2621_v51  ;;  %v1380_v3 = vmul.f32 %v1376_v41, %v1324_v9 }
 0x297   : > { %v859_v44 = vmul.f32 %v2580_v52, %v855_v36  ;;  %v853_v58 = vmul.f32 %v2598_v10, %v849_v50  ;;  %1933 = vpow2.f32 %v1383_v55  ;;  %vm1400_vm8 = vcmp.lt.f32.partialorder %v2592_v2, 0.0 }
 0x298   : > { %v864_v53 = vadd.f32 0.2548296, %v860_v38  ;;  %v858_v54 = vadd.f32 -0.28449672, %v854_v40  ;;  %v1331_v8 = vadd.f32 1.0, %v1327_v60  ;;  %vm1399_vm9 = vcmp.lt.f32.partialorder %v2609_v18, 0.0 }
 0x299   : > { %v2623_v57 = vpop.eup %1921  ;;  %v863_v20 = vadd.f32 0.2548296, %v859_v44  ;;  %v857_v6 = vadd.f32 -0.28449672, %v853_v58  ;;  %v1387_v30 = vmul.f32 1.442695, %v1380_v3 }
 0x29a   : > { %v2628_v24 = vpop.eup %1923  ;;  %v868_v61 = vmul.f32 %v2577_v48, %v864_v53  ;;  %v862_v0 = vmul.f32 %v2589_v63, %v858_v54  ;;  %v1338_v1 = vmul.f32 1.0614054, %v2623_v57  ;;  %1935 = vrcp.f32 %v1331_v8 }
 0x29b   : > { %v1926_v4 = vpop.eup %1925  ;;  %v867_v5 = vmul.f32 %v2580_v52, %v863_v20  ;;  %v1337_v7 = vmul.f32 1.0614054, %v2628_v24  ;;  %v861_v15 = vmul.f32 %v2598_v10, %v857_v6  ;;  %1937 = vpow2.f32 %v1381_v59 }
 0x29c   : > { %v1928_v11 = vpop.eup %1927  ;;  %v888_v12 = vmul.f32 %v1920_v42, %v868_v61  ;;  %v866_v13 = vadd.f32 0.2548296, %v862_v0  ;;  %v1342_v14 = vadd.f32 -1.4531521, %v1338_v1  ;;  %1939 = vpow2.f32 %v1387_v30 }
 0x29d   : > { %v887_v48 = vmul.f32 %v1926_v4, %v867_v5  ;;  %v1341_v16 = vadd.f32 -1.4531521, %v1337_v7  ;;  %v865_v27 = vadd.f32 0.2548296, %v861_v15 }
 0x29e   : > { %v892_v9 = vsub.f32 1.0, %v888_v12  ;;  %v870_v52 = vmul.f32 %v2589_v63, %v866_v13  ;;  %v1346_v22 = vmul.f32 %v2623_v57, %v1342_v14  ;;  %v2640_v23 = vpop.eup %1929  ;;  %v1375_v63 = vsub.f32 0.0, %v2621_v51 }
 0x29f   : > { %v891_v25 = vsub.f32 1.0, %v887_v48  ;;  %v1345_v29 = vmul.f32 %v2628_v24, %v1341_v16  ;;  %v1340_v35 = vmul.f32 1.0614054, %v2640_v23  ;;  %v869_v37 = vmul.f32 %v2598_v10, %v865_v27  ;;  %v1932_v40 = vpop.eup %1931 }
 0x2a0   : > { %v900_v31 = vsub.f32 0.0, %v892_v9  ;;  %v890_v33 = vmul.f32 %v1928_v11, %v870_v52  ;;  %v1350_v34 = vadd.f32 1.4214138, %v1346_v22  ;;  %v813_v48 = vmul.f32 0.5, %v2560_v28 }
 0x2a1   : > { %v899_v36 = vsub.f32 0.0, %v891_v25  ;;  %v1349_v38 = vadd.f32 1.4214138, %v1345_v29  ;;  %v1344_v50 = vadd.f32 -1.4531521, %v1340_v35  ;;  %v889_v55 = vmul.f32 %v1932_v40, %v869_v37  ;;  %v1934_v1 = vpop.eup %1933 }
 0x2a2   : > { %v904_v41 = vsel %vm896_vm1, %v900_v31, %v892_v9  ;;  %v894_v42 = vsub.f32 1.0, %v890_v33  ;;  %v1354_v44 = vmul.f32 %v2623_v57, %v1350_v34 }
 0x2a3   : > { %v908_v53 = vadd.f32 1.0, %v904_v41  ;;  %v903_v54 = vsel %vm895_vm2, %v899_v36, %v891_v25  ;;  %v1353_v20 = vmul.f32 %v2628_v24, %v1349_v38  ;;  %v1348_v60 = vmul.f32 %v2640_v23, %v1344_v50 }
 0x2a4   : > { %v907_v10 = vadd.f32 1.0, %v903_v54  ;;  %v902_v58 = vsub.f32 0.0, %v894_v42  ;;  %v1358_v59 = vadd.f32 -0.28449672, %v1354_v44  ;;  %v893_v61 = vsub.f32 1.0, %v889_v55  ;;  %v1936_v6 = vpop.eup %1935 }
 0x2a5   : > { %v912_v19 = vmul.f32 %v908_v53, %v2602_v17  ;;  %v1357_v0 = vadd.f32 -0.28449672, %v1353_v20  ;;  %v1352_v5 = vadd.f32 1.4214138, %v1348_v60  ;;  %v1938_v26 = vpop.eup %1937  ;;  %v1339_v13 = vmul.f32 1.0614054, %v1936_v6 }
 0x2a6   : > { %v911_v3 = vmul.f32 %v907_v10, %v2613_v39  ;;  %v906_v21 = vsel %vm898_vm4, %v902_v58, %v894_v42  ;;  %v1362_v4 = vmul.f32 %v2623_v57, %v1358_v59  ;;  %v901_v7 = vsub.f32 0.0, %v893_v61  ;;  %v1940_v35 = vpop.eup %1939 }
 0x2a7   : > { %917 = vst.msk [vmem:[%s2660_s15 + $0x8] sm:$0xff] %vm915_vm3, %v912_v19  ;;  %v910_v17 = vadd.f32 1.0, %v906_v21  ;;  %v1361_v8 = vmul.f32 %v2628_v24, %v1357_v0  ;;  %v1379_v39 = vmul.f32 %v1375_v63, %v2621_v51  ;;  %v1356_v12 = vmul.f32 %v2640_v23, %v1352_v5 }
 0x2a8   : > { %916 = vst.msk [vmem:[%s2660_s15] sm:$0xff] %vm915_vm3, %v911_v3  ;;  %v1366_v11 = vadd.f32 0.2548296, %v1362_v4  ;;  %v905_v15 = vsel %vm897_vm5, %v901_v7, %v893_v61  ;;  %v1343_v22 = vadd.f32 -1.4531521, %v1339_v13  ;;  %v1314_v42 = vmul.f32 0.5, %v2567_v43 }
 0x2a9   : > { %v914_v14 = vmul.f32 %v910_v17, %v2618_v49  ;;  %v1365_v16 = vadd.f32 0.2548296, %v1361_v8  ;;  %v909_v9 = vadd.f32 1.0, %v905_v15  ;;  %v1360_v51 = vadd.f32 -0.28449672, %v1356_v12 }
 0x2aa   : > { %v1370_v52 = vmul.f32 %v2623_v57, %v1366_v11  ;;  %v1385_v25 = vmul.f32 1.442695, %v1379_v39  ;;  %v1347_v49 = vmul.f32 %v1936_v6, %v1343_v22  ;;  %v1313_v53 = vmul.f32 0.5, %v2572_v46 }
 0x2ab   : > { %919 = vst.msk [vmem:[%s2660_s15 + $0x18] sm:$0xff] %vm915_vm3, %v914_v14  ;;  %v1369_v32 = vmul.f32 %v2628_v24, %v1365_v16  ;;  %v913_v27 = vmul.f32 %v909_v9, %v813_v48  ;;  %v1364_v30 = vmul.f32 %v2640_v23, %v1360_v51  ;;  %v1316_v46 = vmul.f32 0.5, %v2584_v56 }
 0x2ac   : > { %v1390_v29 = vmul.f32 %v1934_v1, %v1370_v52  ;;  %v1351_v34 = vadd.f32 1.4214138, %v1347_v49  ;;  %1941 = vpow2.f32 %v1385_v25  ;;  %v1315_v3 = vmul.f32 0.5, %v2587_v62 }
 0x2ad   : > { %v1389_v31 = vmul.f32 %v1938_v26, %v1369_v32  ;;  %918 = vst.msk [vmem:[%s2660_s15 + $0x10] sm:$0xff] %vm915_vm3, %v913_v27  ;;  %v1368_v33 = vadd.f32 0.2548296, %v1364_v30 }
 0x2ae   : > { %v1394_v28 = vsub.f32 1.0, %v1390_v29  ;;  %v1355_v38 = vmul.f32 %v1936_v6, %v1351_v34 }
 0x2af   : > { %v1393_v57 = vsub.f32 1.0, %v1389_v31  ;;  %v1372_v37 = vmul.f32 %v2640_v23, %v1368_v33 }
 0x2b0   : > { %v1402_v36 = vsub.f32 0.0, %v1394_v28  ;;  %v1359_v41 = vadd.f32 -0.28449672, %v1355_v38 }
 0x2b1   : > { %v1401_v24 = vsub.f32 0.0, %v1393_v57  ;;  %v1392_v40 = vmul.f32 %v1940_v35, %v1372_v37 }
 0x2b2   : > { %v1406_v63 = vsel %vm1398_vm6, %v1402_v36, %v1394_v28  ;;  %v1363_v23 = vmul.f32 %v1936_v6, %v1359_v41 }
 0x2b3   : > { %v1410_v44 = vadd.f32 1.0, %v1406_v63  ;;  %v1405_v50 = vsel %vm1397_vm7, %v1401_v24, %v1393_v57  ;;  %v1396_v55 = vsub.f32 1.0, %v1392_v40 }
 0x2b4   : > { %v1409_v54 = vadd.f32 1.0, %v1405_v50  ;;  %v1367_v58 = vadd.f32 0.2548296, %v1363_v23 }
 0x2b5   : > { %v1414_v20 = vmul.f32 %v1410_v44, %v1314_v42  ;;  %v1404_v10 = vsub.f32 0.0, %v1396_v55 }
 0x2b6   : > { %v1413_v45 = vmul.f32 %v1409_v54, %v1313_v53  ;;  %v1371_v47 = vmul.f32 %v1936_v6, %v1367_v58  ;;  %v1942_v59 = vpop.eup %1941 }
 0x2b7   : > { %1632 = vst.msk [vmem:[%s2660_s15 + $0x28] sm:$0xff] %vm915_vm3, %v1414_v20  ;;  %v1408_v43 = vsel %vm1400_vm8, %v1404_v10, %v1396_v55 }
 0x2b8   : > { %1631 = vst.msk [vmem:[%s2660_s15 + $0x20] sm:$0xff] %vm915_vm3, %v1413_v45  ;;  %v1412_v60 = vadd.f32 1.0, %v1408_v43  ;;  %v1391_v19 = vmul.f32 %v1942_v59, %v1371_v47 }
 0x2ba   : > { %v1416_v61 = vmul.f32 %v1412_v60, %v1316_v46  ;;  %v1395_v0 = vsub.f32 1.0, %v1391_v19 }
 0x2bc   : > { %1634 = vst.msk [vmem:[%s2660_s15 + $0x38] sm:$0xff] %vm915_vm3, %v1416_v61  ;;  %v1403_v1 = vsub.f32 0.0, %v1395_v0 }
 0x2be   : > { %v1407_v2 = vsel %vm1399_vm9, %v1403_v1, %v1395_v0 }
 0x2bf   : > { %v1411_v21 = vadd.f32 1.0, %v1407_v2 }
 0x2c1   : > { %v1415_v56 = vmul.f32 %v1411_v21, %v1315_v3 }
 0x2c3   : > { %1633 = vst.msk [vmem:[%s2660_s15 + $0x30] sm:$0xff] %vm915_vm3, %v1415_v56 }
 0x2c4   : > { %2100 = shalt.err (!%p2097_p3)
}
 0x2c5   : > { %s2101_s16 = scalar_lea.hbm %s2699_s20, 1024  ;;  %s2105_s15 = scalar_lea.hbm %s2754_s7, 2048 }
 0x2c6   : > { %p2102_p6 = scmp.ne.s32.totalorder %s2699_s20, %s2101_s16  ;;  %p2106_p7 = scmp.lt.u32.totalorder %s2699_s20, %s2754_s7 }
 0x2c7   : > { %p2107_p4 = scmp.lt.u32.totalorder %s2105_s15, %s2101_s16  ;;  %p2109_p8 = scmp.lt.u32.totalorder %s2101_s16, %s2699_s20 }
 0x2c8   : > { %p2103_p5 = pnand %p2102_p6, %p2776_p9 }
 0x2c9   : > { %p2108_p0 = por %p2107_p4, %p2106_p7 }
 0x2ca   : > { %p2104_p2 = pneg %p2103_p5 }
 0x2cb   : > { %p2110_p10 = por %p2109_p8, %p2108_p0 }
 0x2cd   : > { %p2111_p11 = pnand %p2110_p10, %p2104_p2 }
 0x2cf   : > { %2114 = shalt.err (!%p2111_p11)
}
 0x2d0   : > { %s2180_s10 = smov 128   ;;  %s2181_s30 = smov 8  }
 0x2d1   : > { %1832 = dma.vmem_to_hbm [thread:$0]  (%p2776_p9), %s2701_s28, 1024, %s2699_s20, %s1423_s13, %s2180_s10, %s2180_s10, %s2181_s30  }
 0x2d2 PF: > { %s1451_s23 = sand.u32 1, %s2157_s24   ;;  %p2777_p13 = scmp.ne.s32.totalorder %s2764_s19, 0 }
 0x2d3   : > { %p2778_p1 = scmp.ge.s32.totalorder %s2169_s27, 2  ;;  %s1452_s12 = scalar_lea.sflag [#allocation4], %s1451_s23 }
 0x2d5   : > { %p1855_p12 = pnand %p2778_p1, %p2777_p13 }
 0x2d7   : > { %2152 = dma.done.wait (!%p1855_p12), %s1452_s12, 1024  }
 0x2d8   : > { %2154 = vsyncadd (!%p1855_p12), %s1452_s12, 4294966272  ;;  %p24_p3 = scmp.ge.s32.totalorder %s2371_s22, 4   ;;  %s2779_s24 = smov %s2161_s25 }
 0x2d9   : > { %s2780_s25 = smov %s2165_s26  ;;  %s2781_s26 = smov %s2383_s29 }
 0x2da   : > { %s2782_s27 = smov %s2371_s22  ;;  %26 = sbr.rel (!%p24_p3) target bundleno = 9 (0x9), region = 118 }
 0x2e1   :  { %1457 = vsyncpa [#allocation3], 1 }
 0x2e2   :  { %1459 = vsyncpa [#allocation3 + $0x1], 1 }
 0x2e3   :  { %1460 = vsyncpa [#allocation7], 1 }
 0x2e4   :  { %1461 = vsyncpa [#allocation10], 1 }
 0x2e5   :  { %1462 = vsyncpa [#allocation4], 1 }
 0x2e6   :  { %1464 = vsyncpa [#allocation4 + $0x1], 1 }
 0x2e7   :  { %1465 = vsyncpa [#allocation5], 1 }
 0x2e8   :  { %1467 = vsyncpa [#allocation5 + $0x1], 1 }
 0x2e9   :  { %1468 = vsyncpa [#allocation13], 1 }

</bundles_post_ra>
